<compile_context>
chip_gen: v6e
topology: v6e:2x2x1
jax: 0.10.0
libtpu: 0.0.40
codegen_flags: <defaults>
</compile_context>

<pallas_src>
import functools
import numpy as np

import jax
import jax.numpy as jnp
from jax.experimental import pallas as pl
from jax.experimental.pallas import tpu as pltpu

N_STYLES = 4          # opts.n_styles (small, synthetic)
NUM_LAYERS = 50       # num_layers in {50, 100, 152}


# ----------------------------------------------------------------------------
# Generation-aware VMEM budget / tile caps
# ----------------------------------------------------------------------------
def _vmem_capacity_bytes():
    try:
        return int(pltpu.get_tpu_info().vmem_capacity_bytes)
    except Exception:
        return 64 * 1024 * 1024          # conservative (v7x-sized) fallback


_VMEM_CAP = _vmem_capacity_bytes()
_BIG_VMEM = _VMEM_CAP >= 96 * 1024 * 1024            # v5e / v6e (128 MiB parts)
_TM_CAP = 1024 if _BIG_VMEM else 512                 # keep v7x (64 MiB VMEM) tiles modest
_TK_CAP = 2048 if _BIG_VMEM else 1024
_VMEM_LIMIT = min(96 * 1024 * 1024,
                  max(32 * 1024 * 1024, _VMEM_CAP - 16 * 1024 * 1024))


# ----------------------------------------------------------------------------
# Pallas kernels
# ----------------------------------------------------------------------------
def _mm_epi_kernel(a_ref, b_ref, p_ref, o_ref, acc_ref):
    """o = PReLU(A@B * scale + shift; alpha).  K-reduction over grid axis 2, f32 accumulator.

    p_ref packs (scale, shift, alpha) as a (3, tn) f32 block -> one small DMA per (i, j) block.
    """
    @pl.when(pl.program_id(2) == 0)
    def _():
        acc_ref[...] = jnp.zeros_like(acc_ref)

    acc_ref[...] += jnp.dot(a_ref[...], b_ref[...],
                            preferred_element_type=jnp.float32)

    @pl.when(pl.program_id(2) == pl.num_programs(2) - 1)
    def _():
        scale = p_ref[0:1, :]
        shift = p_ref[1:2, :]
        alpha = p_ref[2:3, :]
        y = acc_ref[...] * scale + shift
        y = jnp.where(y >= 0, y, y * alpha)
        o_ref[...] = y.astype(o_ref.dtype)


def _mm_epi_res_kernel(a_ref, b_ref, p_ref, res_ref, o_ref, acc_ref):
    """Same as _mm_epi_kernel, plus a fused residual add (residual streamed in bf16)."""
    @pl.when(pl.program_id(2) == 0)
    def _():
        acc_ref[...] = jnp.zeros_like(acc_ref)

    acc_ref[...] += jnp.dot(a_ref[...], b_ref[...],
                            preferred_element_type=jnp.float32)

    @pl.when(pl.program_id(2) == pl.num_programs(2) - 1)
    def _():
        scale = p_ref[0:1, :]
        shift = p_ref[1:2, :]
        alpha = p_ref[2:3, :]
        y = acc_ref[...] * scale + shift
        y = jnp.where(y >= 0, y, y * alpha)
        y = y + res_ref[...].astype(jnp.float32)
        o_ref[...] = y.astype(o_ref.dtype)


# ----------------------------------------------------------------------------
# Pallas wrapper (fused matmul + BN/PReLU/residual epilogue)
# ----------------------------------------------------------------------------
def _round_up(x, m):
    return ((x + m - 1) // m) * m


def _pick_tk(kp, cap):
    """Largest multiple of 128 that is <= cap and divides kp (kp is a multiple of 128)."""
    for cand in range(cap, 0, -128):
        if kp % cand == 0:
            return cand
    return 128


def _pick_tm(m, cap):
    """Pick (tm, Mp): prefer tm that divides round_up(m, 16) (no padded copy of the big A)."""
    mp = _round_up(m, 16)
    if mp <= cap:
        return mp, mp
    c = cap
    best = None
    while c >= 128:
        mpp = _round_up(mp, c)
        pad = mpp - mp
        if pad == 0:
            return c, mpp                 # largest divisor wins (descending loop)
        if best is None or pad < best[2]:
            best = (c, mpp, pad)
        c //= 2
    return best[0], best[1]


def mm_epilogue(a, b, scale=None, shift=None, alpha=None, res=None,
                out_dtype=jnp.bfloat16):
    """y = PReLU((a @ b) * scale + shift; alpha) [+ res].

    a: (M, K), b: (K, N) [fed to the MXU in bf16]; scale/shift/alpha: (N,) or None (identity);
    res: (M, N) or None (streamed in bf16).  Accumulation and epilogue run in f32; the output
    dtype is bf16 for intermediate activations (default) or f32 for the final layer.
    """
    M, K = a.shape
    Kb, N = b.shape
    assert K == Kb

    scale = jnp.ones((N,), jnp.float32) if scale is None else scale.astype(jnp.float32)
    shift = jnp.zeros((N,), jnp.float32) if shift is None else shift.astype(jnp.float32)
    alpha = jnp.ones((N,), jnp.float32) if alpha is None else alpha.astype(jnp.float32)

    # Adaptive padding/tiling: K padded by < 128, tn=256 where possible, tm divisor-friendly.
    Kp = _round_up(K, 128)
    tk = _pick_tk(Kp, _TK_CAP)
    Np = _round_up(N, 128)
    tn = 256 if Np % 256 == 0 else 128
    tm, Mp = _pick_tm(M, _TM_CAP)

    # Guarantee >= 2 parallel grid blocks so both v7x TensorCores get work (harmless elsewhere).
    if (Mp // tm) * (Np // tn) < 2:
        if tm >= 32:
            tm //= 2
        elif tn > 128:
            tn = 128

    a_p = a.astype(jnp.bfloat16)
    if (Mp, Kp) != (M, K):
        a_p = jnp.pad(a_p, ((0, Mp - M), (0, Kp - K)))
    b_p = b.astype(jnp.bfloat16)
    if (Kp, Np) != (K, N):
        b_p = jnp.pad(b_p, ((0, Kp - K), (0, Np - N)))
    params = jnp.stack([scale, shift, alpha])                    # (3, N) f32
    if Np != N:
        params = jnp.pad(params, ((0, 0), (0, Np - N)))

    grid = (Mp // tm, Np // tn, Kp // tk)
    in_specs = [
        pl.BlockSpec((tm, tk), lambda i, j, k: (i, k)),
        pl.BlockSpec((tk, tn), lambda i, j, k: (k, j)),
        pl.BlockSpec((3, tn), lambda i, j, k: (0, j)),
    ]
    out_spec = pl.BlockSpec((tm, tn), lambda i, j, k: (i, j))
    cparams = pltpu.CompilerParams(
        dimension_semantics=("parallel", "parallel", "arbitrary"),
        vmem_limit_bytes=_VMEM_LIMIT)

    if res is None:
        out = pl.pallas_call(
            _mm_epi_kernel,
            out_shape=jax.ShapeDtypeStruct((Mp, Np), out_dtype),
            grid_spec=pltpu.PrefetchScalarGridSpec(
                num_scalar_prefetch=0,
                grid=grid,
                in_specs=in_specs,
                out_specs=out_spec,
                scratch_shapes=[pltpu.VMEM((tm, tn), jnp.float32)],
            ),
            compiler_params=cparams,
        )(a_p, b_p, params)
    else:
        res_p = res.astype(jnp.bfloat16)
        if (Mp, Np) != res_p.shape:
            res_p = jnp.pad(res_p, ((0, Mp - M), (0, Np - N)))
        out = pl.pallas_call(
            _mm_epi_res_kernel,
            out_shape=jax.ShapeDtypeStruct((Mp, Np), out_dtype),
            grid_spec=pltpu.PrefetchScalarGridSpec(
                num_scalar_prefetch=0,
                grid=grid,
                in_specs=in_specs + [pl.BlockSpec((tm, tn), lambda i, j, k: (i, j))],
                out_specs=out_spec,
                scratch_shapes=[pltpu.VMEM((tm, tn), jnp.float32)],
            ),
            compiler_params=cparams,
        )(a_p, b_p, params, res_p)
    return out[:M, :N]


# ----------------------------------------------------------------------------
# Conv / dense glue (im2col -> fused Pallas matmul)
# ----------------------------------------------------------------------------
def conv3x3_fused(x, w_mat, stride, scale=None, shift=None, alpha=None, res=None):
    """3x3 conv, padding=1, no bias; fused BN(scale/shift) + PReLU(alpha) + residual epilogue.

    w_mat is the pre-reshaped (9*Cin, Cout) bf16 weight.  The bf16 im2col patch matrix (plus any
    preceding per-channel affine on x) is one XLA fusion feeding the Pallas matmul.
    """
    N, H, W, Cin = x.shape
    Cout = w_mat.shape[1]
    Ho = (H - 1) // stride + 1
    Wo = (W - 1) // stride + 1
    xp = jnp.pad(x.astype(jnp.bfloat16), ((0, 0), (1, 1), (1, 1), (0, 0)))
    pats = [xp[:, ky:ky + (Ho - 1) * stride + 1:stride,
               kx:kx + (Wo - 1) * stride + 1:stride, :]
            for ky in range(3) for kx in range(3)]
    a = jnp.stack(pats, axis=3).reshape(N * Ho * Wo, 9 * Cin)
    res2 = res.reshape(N * Ho * Wo, Cout) if res is not None else None
    y = mm_epilogue(a, w_mat, scale=scale, shift=shift, alpha=alpha, res=res2)
    return y.reshape(N, Ho, Wo, Cout)


def conv1x1_fused(x, w_io, scale=None, shift=None, alpha=None, res=None):
    """1x1 conv (stride applied by caller) with fused epilogue."""
    N, H, W, Cin = x.shape
    Cout = w_io.shape[1]
    res2 = res.reshape(-1, Cout) if res is not None else None
    y = mm_epilogue(x.reshape(-1, Cin), w_io, scale=scale, shift=shift, alpha=alpha, res=res2)
    return y.reshape(N, H, W, Cout)


def dense_fused(a, w_io, bias, out_dtype=jnp.bfloat16):
    """Linear layer: a @ w + bias (bias fused as epilogue shift)."""
    return mm_epilogue(a, w_io, shift=bias, out_dtype=out_dtype)


def adaptive_pool_matrix(hin, win, hout, wout):
    P = np.zeros((hin * win, hout * wout), np.float32)
    for oh in range(hout):
        hs = (oh * hin) // hout
        he = -((-(oh + 1) * hin) // hout)
        for ow in range(wout):
            ws = (ow * win) // wout
            we = -((-(ow + 1) * win) // wout)
            cnt = (he - hs) * (we - ws)
            for h in range(hs, he):
                for w in range(ws, we):
                    P[h * win + w, oh * wout + ow] = 1.0 / cnt
    return jnp.asarray(P)


# ----------------------------------------------------------------------------
# Parameters (deterministic synthetic init; weights pre-cast/pre-reshaped to bf16 matmul layout)
# ----------------------------------------------------------------------------
def ir_units(num_layers):
    assert num_layers in (50, 100, 152)
    if num_layers == 50:
        cfg = [(64, 64, 3), (64, 128, 4), (128, 256, 14), (256, 512, 3)]
    elif num_layers == 100:
        cfg = [(64, 64, 3), (64, 128, 13), (128, 256, 30), (256, 512, 3)]
    else:
        cfg = [(64, 64, 3), (64, 128, 8), (128, 256, 36), (256, 512, 3)]
    units = []
    for in_c, depth, n in cfg:
        units.append((in_c, depth, 2))
        units.extend([(depth, depth, 1)] * (n - 1))
    return units


def _normal(key, shape, scale):
    return scale * jax.random.normal(key, shape, jnp.float32)


def _conv3x3_weight(key, cin, cout):
    w = _normal(key, (3, 3, cin, cout), 1.0 / np.sqrt(9 * cin))
    return w.reshape(9 * cin, cout).astype(jnp.bfloat16)      # (ky,kx,cin)-major rows


def _bn_params(key, c):
    """Eval-mode BN folded to per-channel scale/shift."""
    ks = jax.random.split(key, 4)
    gamma = 1.0 + 0.05 * jax.random.normal(ks[0], (c,), jnp.float32)
    beta = 0.05 * jax.random.normal(ks[1], (c,), jnp.float32)
    mean = 0.05 * jax.random.normal(ks[2], (c,), jnp.float32)
    var = jnp.abs(1.0 + 0.05 * jax.random.normal(ks[3], (c,), jnp.float32))
    scale = gamma / jnp.sqrt(var + 1e-5)
    shift = beta - mean * scale
    return scale, shift


def _unit_params(key, in_c, depth):
    ks = jax.random.split(key, 6)
    up = {
        "bn1": _bn_params(ks[0], in_c),
        "w1": _conv3x3_weight(ks[1], in_c, depth),
        "prelu": jnp.full((depth,), 0.25, jnp.float32),
        "w2": _conv3x3_weight(ks[2], depth, depth),
        "bn2": _bn_params(ks[3], depth),
    }
    if in_c != depth:
        up["w_sc"] = _normal(ks[4], (in_c, depth), 1.0 / np.sqrt(in_c)).astype(jnp.bfloat16)
        up["bn_sc"] = _bn_params(ks[5], depth)
    return up


def init_params(key, n_styles, num_layers):
    units = ir_units(num_layers)
    keys = list(jax.random.split(key, len(units) + 8))
    ki = iter(keys)
    p = {}
    p["w_in"] = _conv3x3_weight(next(ki), 3, 64)
    p["bn_in"] = _bn_params(next(ki), 64)
    p["prelu_in"] = jnp.full((64,), 0.25, jnp.float32)
    p["body"] = [_unit_params(next(ki), in_c, depth) for (in_c, depth, _) in units]
    p["bn_out"] = _bn_params(next(ki), 512)
    p["fc_w"] = _normal(next(ki), (512 * 7 * 7, 512),
                        1.0 / np.sqrt(512 * 7 * 7)).astype(jnp.bfloat16)
    p["fc_b"] = _normal(next(ki), (512,), 0.01)
    # EqualLinear(512, 512*n_styles, lr_mul=1): weight=randn(out,in)/lr_mul (stored as (in,out)),
    # bias=zeros.  The call-time scale 1/sqrt(in_dim)*lr_mul is folded into the weight ONCE here.
    eq_scale = 1.0 / np.sqrt(512.0)
    p["eq_w"] = (_normal(next(ki), (512, 512 * n_styles), 1.0) * eq_scale).astype(jnp.bfloat16)
    p["eq_b"] = jnp.zeros((512 * n_styles,), jnp.float32)
    return p, units


# ----------------------------------------------------------------------------
# Forward pass (matches torch module semantics, eval-mode BN)
# ----------------------------------------------------------------------------
@jax.jit
def input_stage(x_nchw, w_in, bn_in, prelu_in):
    # input_layer: Conv2d(3,64,3,1,1,bias=False) -> BN(64) -> PReLU(64)   (BN+PReLU fused)
    x = jnp.transpose(x_nchw.astype(jnp.float32), (0, 2, 3, 1))          # NCHW -> NHWC
    return conv3x3_fused(x, w_in, 1, scale=bn_in[0], shift=bn_in[1], alpha=prelu_in)


@functools.partial(jax.jit, static_argnames=("in_c", "depth", "stride"))
def bottleneck_ir(x, p, *, in_c, depth, stride):
    # shortcut branch
    if in_c == depth:
        sc = x[:, ::stride, ::stride, :] if stride > 1 else x            # MaxPool2d(1, stride)
    else:
        xs = x[:, ::stride, ::stride, :] if stride > 1 else x
        # Conv2d(1x1, stride, bias=False) with BatchNorm2d fused into the matmul epilogue.
        sc = conv1x1_fused(xs, p["w_sc"], scale=p["bn_sc"][0], shift=p["bn_sc"][1])
    # residual branch: BN -> Conv3x3(s=1) -> PReLU -> Conv3x3(stride) -> BN, then +shortcut.
    # Pre-conv BN is plain jnp so XLA fuses it into conv1's bf16 im2col producer; PReLU is
    # fused into conv1's epilogue, BN2 + residual add are fused into conv2's epilogue.
    r = x.astype(jnp.float32) * p["bn1"][0] + p["bn1"][1]
    r = conv3x3_fused(r, p["w1"], 1, alpha=p["prelu"])
    r = conv3x3_fused(r, p["w2"], stride, scale=p["bn2"][0], shift=p["bn2"][1], res=sc)
    return r


@functools.partial(jax.jit, static_argnames=("n_styles",))
def head_stage(x, bn_out, fc_w, fc_b, eq_w, eq_b, *, n_styles):
    # output_layer_2: BN(512) -> AdaptiveAvgPool2d((7,7)) -> Flatten -> Linear(512*49, 512)
    N, H, W, C = x.shape
    x = x.astype(jnp.float32) * bn_out[0] + bn_out[1]                    # BN fused by XLA
    x_cl = jnp.transpose(x, (0, 3, 1, 2)).reshape(N * C, H * W)          # torch CHW order
    P = adaptive_pool_matrix(H, W, 7, 7)                                 # (H*W, 49)
    pooled = jnp.dot(x_cl, P)          # tiny (K=H*W, N=49) matmul: leave to XLA, not Pallas
    flat = pooled.reshape(N, C * 49)                                     # torch flatten order
    y = dense_fused(flat, fc_w, fc_b)                                    # (N, 512) bf16
    # EqualLinear(512, 512*n_styles, lr_mul=1); weight already pre-scaled at init.
    y = dense_fused(y, eq_w, eq_b, out_dtype=jnp.float32)                # (N, 512*n_styles)
    return y.reshape(-1, n_styles, 512)


def forward(params, units, x_nchw, n_styles):
    x = input_stage(x_nchw, params["w_in"], params["bn_in"], params["prelu_in"])
    for p, (in_c, depth, stride) in zip(params["body"], units):
        x = bottleneck_ir(x, p, in_c=in_c, depth=depth, stride=stride)
    return head_stage(x, params["bn_out"], params["fc_w"], params["fc_b"],
                      params["eq_w"], params["eq_b"], n_styles=n_styles)


# ----------------------------------------------------------------------------
if __name__ == "__main__":
    key = jax.random.PRNGKey(0)
    pkey, xkey = jax.random.split(key)

    params, units = init_params(pkey, N_STYLES, NUM_LAYERS)

    # Small, module-consistent input: NCHW, 3 input channels (Conv2d(3, 64, ...)).
    x = jax.random.normal(xkey, (2, 3, 32, 32), jnp.float32)

    out = forward(params, units, x, N_STYLES)
    out = jax.block_until_ready(out)

    assert out.shape == (2, N_STYLES, 512), out.shape
    assert bool(jnp.all(jnp.isfinite(out)))
    print("KERNEL_OK")
</pallas_src>

<mosaic_0001>
module attributes {stable_mosaic.version = 11 : i64} {
  func.func @_mm_epi_kernel(%arg0: i32, %arg1: i32, %arg2: i32, %arg3: memref<512x128xbf16, #tpu.memory_space<vmem>>, %arg4: memref<128x128xbf16, #tpu.memory_space<vmem>>, %arg5: memref<3x128xf32, #tpu.memory_space<vmem>>, %arg6: memref<512x128xbf16, #tpu.memory_space<vmem>>, %arg7: memref<512x128xf32, #tpu.memory_space<vmem>>) attributes {dimension_semantics = [#tpu.dimension_semantics<parallel>, #tpu.dimension_semantics<parallel>, #tpu.dimension_semantics<arbitrary>], iteration_bounds = array<i64: 4, 1, 1>, scalar_prefetch = 0 : i64, scratch_operands = 1 : i64, tpu.core_type = #tpu.core_type<tc>, window_params = [{transform_indices = @transform_0, window_bounds = array<i64: 512, 128>}, {transform_indices = @transform_1, window_bounds = array<i64: 128, 128>}, {transform_indices = @transform_2, window_bounds = array<i64: 3, 128>}, {transform_indices = @transform_3, window_bounds = array<i64: 512, 128>}]} {
    %c0_i32 = arith.constant 0 : i32
    %0 = arith.cmpi eq, %arg2, %c0_i32 : i32
    %1 = arith.extui %0 : i1 to i32
    %c0_i32_0 = arith.constant 0 : i32
    %2 = arith.cmpi ne, %1, %c0_i32_0 : i32
    scf.if %2 {
      %cst_10 = arith.constant 0.000000e+00 : f32
      %12 = vector.broadcast %cst_10 : f32 to vector<512x128xf32>
      %c0_11 = arith.constant 0 : index
      %c0_12 = arith.constant 0 : index
      %13 = vector.load %arg7[%c0_11, %c0_12] : memref<512x128xf32, #tpu.memory_space<vmem>>, vector<512x128xf32>
      tpu.vector_store %arg7[%c0_11, %c0_12], %12 {strides = array<i32>} : memref<512x128xf32, #tpu.memory_space<vmem>>, vector<512x128xf32>,
    } else {
    }
    %c0 = arith.constant 0 : index
    %c0_1 = arith.constant 0 : index
    %3 = vector.load %arg7[%c0, %c0_1] : memref<512x128xf32, #tpu.memory_space<vmem>>, vector<512x128xf32>
    %c0_2 = arith.constant 0 : index
    %c0_3 = arith.constant 0 : index
    %4 = vector.load %arg3[%c0_2, %c0_3] : memref<512x128xbf16, #tpu.memory_space<vmem>>, vector<512x128xbf16>
    %c0_4 = arith.constant 0 : index
    %c0_5 = arith.constant 0 : index
    %5 = vector.load %arg4[%c0_4, %c0_5] : memref<128x128xbf16, #tpu.memory_space<vmem>>, vector<128x128xbf16>
    %cst = arith.constant dense<0.000000e+00> : vector<512x128xf32>
    %6 = tpu.matmul %4, %5, %cst {dimension_numbers = #tpu.dot_dimension_numbers<[1], [0], [0], [1], [0, 0, 1, 1], [], []>} : vector<512x128xbf16>, vector<128x128xbf16>, vector<512x128xf32> -> vector<512x128xf32>
    %7 = arith.addf %3, %6 : vector<512x128xf32>
    %c0_6 = arith.constant 0 : index
    %c0_7 = arith.constant 0 : index
    %8 = vector.load %arg7[%c0_6, %c0_7] : memref<512x128xf32, #tpu.memory_space<vmem>>, vector<512x128xf32>
    tpu.vector_store %arg7[%c0_6, %c0_7], %7 {strides = array<i32>} : memref<512x128xf32, #tpu.memory_space<vmem>>, vector<512x128xf32>,
    %c0_i32_8 = arith.constant 0 : i32
    %9 = arith.cmpi eq, %arg2, %c0_i32_8 : i32
    %10 = arith.extui %9 : i1 to i32
    %c0_i32_9 = arith.constant 0 : i32
    %11 = arith.cmpi ne, %10, %c0_i32_9 : i32
    scf.if %11 {
      %c0_10 = arith.constant 0 : index
      %c0_11 = arith.constant 0 : index
      %12 = vector.load %arg5[%c0_10, %c0_11] : memref<3x128xf32, #tpu.memory_space<vmem>>, vector<1x128xf32>
      %c1 = arith.constant 1 : index
      %c0_12 = arith.constant 0 : index
      %13 = vector.load %arg5[%c1, %c0_12] : memref<3x128xf32, #tpu.memory_space<vmem>>, vector<1x128xf32>
      %c2 = arith.constant 2 : index
      %c0_13 = arith.constant 0 : index
      %14 = vector.load %arg5[%c2, %c0_13] : memref<3x128xf32, #tpu.memory_space<vmem>>, vector<1x128xf32>
      %c0_14 = arith.constant 0 : index
      %c0_15 = arith.constant 0 : index
      %15 = vector.load %arg7[%c0_14, %c0_15] : memref<512x128xf32, #tpu.memory_space<vmem>>, vector<512x128xf32>
      %16 = vector.broadcast %12 : vector<1x128xf32> to vector<512x128xf32>
      %17 = arith.mulf %15, %16 : vector<512x128xf32>
      %18 = vector.broadcast %13 : vector<1x128xf32> to vector<512x128xf32>
      %19 = arith.addf %17, %18 : vector<512x128xf32>
      %cst_16 = arith.constant 0.000000e+00 : f32
      %20 = vector.broadcast %cst_16 : f32 to vector<512x128xf32>
      %21 = arith.cmpf oge, %19, %20 : vector<512x128xf32>
      %22 = vector.broadcast %14 : vector<1x128xf32> to vector<512x128xf32>
      %23 = arith.mulf %19, %22 : vector<512x128xf32>
      %24 = arith.select %21, %19, %23 : vector<512x128xi1>, vector<512x128xf32>
      %25 = arith.truncf %24 : vector<512x128xf32> to vector<512x128xbf16>
      %c0_17 = arith.constant 0 : index
      %c0_18 = arith.constant 0 : index
      %26 = vector.load %arg6[%c0_17, %c0_18] : memref<512x128xbf16, #tpu.memory_space<vmem>>, vector<512x128xbf16>
      tpu.vector_store %arg6[%c0_17, %c0_18], %25 {strides = array<i32>} : memref<512x128xbf16, #tpu.memory_space<vmem>>, vector<512x128xbf16>,
    } else {
    }
    return
  }
  func.func @transform_0(%arg0: i32, %arg1: i32, %arg2: i32) -> (i32, i32) {
    %c0_i32 = arith.constant 0 : i32
    return %arg0, %arg2 : i32, i32
  }
  func.func @transform_1(%arg0: i32, %arg1: i32, %arg2: i32) -> (i32, i32) {
    %c0_i32 = arith.constant 0 : i32
    return %arg2, %arg1 : i32, i32
  }
  func.func @transform_2(%arg0: i32, %arg1: i32, %arg2: i32) -> (i32, i32) {
    %c0_i32 = arith.constant 0 : i32
    %c0_i32_0 = arith.constant 0 : i32
    return %c0_i32, %arg1 : i32, i32
  }
  func.func @transform_3(%arg0: i32, %arg1: i32, %arg2: i32) -> (i32, i32) {
    %c0_i32 = arith.constant 0 : i32
    return %arg0, %arg1 : i32, i32
  }
}

</mosaic_0001>

<bundles_post_ra>
// kernel: input_stage.1
= control target key start
LH: loop header
LB: loop body
LE: loop exit
PB: predicated region body
PF: predicated region fallthrough
CT: control target
= control target key end

     0   :  { %8 = vsyncpa [#allocation4], 0  ;;  %s3146_s0 = inlined_call_operand.vmem [shape: bf16[2048,128], index: 0, kind: input, shape index: {}]   ;;  %s3147_s1 = inlined_call_operand.vmem [shape: bf16[128,128], index: 1, kind: input, shape index: {}]   ;;  %s3148_s2 = inlined_call_operand.vmem [shape: f32[3,128], index: 2, kind: input, shape index: {}]   ;;  %s3149_s3 = inlined_call_operand.hbm [shape: bf16[2048,128], index: 3, kind: output, shape index: {}]  }
   0x1   :  { %10 = vsyncpa [#allocation4 + $0x1], 0  ;;  %s2684_s12 = smov 0   ;;  %s2686_s13 = smov 0  }
   0x2   :  { %s2688_s14 = smov 0   ;;  %s2690_s15 = smov 0  }
   0x3   :  { %s2692_s16 = smov 0   ;;  %s2694_s17 = smov 0  }
   0x4 LB: > { %s1972_s18 = sadd.s32 4294967295, %s2659_s17   ;;  %s1973_s19 = sadd.s32 4294967294, %s2659_s17   ;;  %s2659_s17 = sphi %s2694_s17, %s16_s17   ;;  %s2655_s16 = sphi %s2692_s16, %s3156_s16   ;;  %s2651_s15 = sphi %s2690_s15, %s3155_s15   ;;  %s2647_s14 = sphi %s2688_s14, %s3154_s14   ;;  %s2643_s13 = sphi %s2686_s13, %s3153_s13   ;;  %s2639_s12 = sphi %s2684_s12, %s3152_s12  }
   0x5   : > { %s35_s20 = sadd.s32 1, %s2655_s16  ;;  %s126_s21 = sadd.s32 1, %s2647_s14 }
   0x6   : > { %p37_p0 = scmp.ge.s32.totalorder %s35_s20, 4  ;;  %p136_p1 = scmp.ne.s32.totalorder %s2647_s14, %s2643_s13 }
   0x7   : > { %p137_p2 = scmp.eq.s32.totalorder %s1972_s18, 3  ;;  %p142_p3 = scmp.ne.s32.totalorder %s2643_s13, %s2639_s12 }
   0x8   : > { %s3158_s20 = smov (%p37_p0, %s35_s20), 0  ;;  %p143_p5 = scmp.eq.s32.totalorder %s1973_s19, 3 }
   0x9   : > { %p2724_p4 = por %p137_p2, %p136_p1  ;;  %s121_s23 = ssub.s32 %s2655_s16, %s3158_s20 }
   0xa   : > { %p1978_p6 = scmp.ge.s32.totalorder %s2659_s17, 1  ;;  %p124_p7 = scmp.eq.s32.totalorder %s121_s23, 0 }
   0xb   : > { %p2731_p8 = por %p143_p5, %p142_p3  ;;  %p192_p9 = scmp.lt.s32.totalorder %s2659_s17, 5 }
   0xc   : > { %s2737_s25 = scalar_select %p124_p7, %s2647_s14, %s126_s21  }
   0xd   : > { %p193_p10 = pnand %p1978_p6, %p192_p9 }
   0xe   : > { %s1980_s28 = sshll.u32 (!%p193_p10), %s2651_s15, 6  ;;  %s2158_s18 = sshll.u32 (!%p193_p10), %s2651_s15, 12 }
   0xf   : > { %196 = sbr.rel (%p193_p10) target bundleno = 355 (0x163), region = 32  ;;  %p232_p11 = scmp.lt.s32.totalorder (!%p193_p10), %s1980_s28, 255 }
  0x10   : > { %s3094_s26 = scalar_lea.hbm (!%p193_p10), %s3149_s3, %s2158_s18 }
  0x14   : > { %v2543_v0 = vld [vmem:[%s3147_s1 + $0x38] sm:$0xff]   ;;  %v2544_v1 = vld [vmem:[%s3147_s1 + $0x30] sm:$0xff]   ;;  %s3160_s28 = smov (!%p232_p11, %s1980_s28), 255  ;;  %v2545_v2 = vld [vmem:[%s3147_s1 + $0x28] sm:$0xff]  }
  0x15   : > { %2390 = vmatprep.subr.bf16.mxu0 %v2543_v0  ;;  %2470 = vmatprep.subr.bf16.mxu1 %v2543_v0  ;;  %s1981_s6 = sshll.u32 %s3160_s28, 2  ;;  %v2546_v3 = vld [vmem:[%s3147_s1 + $0x20] sm:$0xff]   ;;  %v2547_v6 = vld [vmem:[%s3147_s1 + $0x18] sm:$0xff]   ;;  %v2548_v7 = vld [vmem:[%s3147_s1 + $0x10] sm:$0xff]   ;;  %s2661_s28 = smov [#allocation3]  }
  0x16   : > { %2391 = vmatpush3.bf16.msra.mxu0 %v2543_v0  ;;  %2478 = vmatpush3.bf16.msra.mxu1 %v2543_v0  ;;  %s2752_s9 = scalar_lea.vmem %s3146_s0, %s1981_s6  ;;  %v2549_v8 = vld [vmem:[%s3147_s1 + $0x8] sm:$0xff]   ;;  %v2550_v9 = vld [vmem:[%s3147_s1] sm:$0xff]   ;;  %s2587_s29 = sshll.u32 %s2661_s28, 4  ;;  %s2588_s29 = int_to_ptr.vmem [resolvable:$false] %s2587_s29 }
  0x17   : > { %2392 = vmatprep.subr.bf16.mxu0 %v2544_v1  ;;  %2471 = vmatprep.subr.bf16.mxu1 %v2544_v1  ;;  %v2551_v4 = vld [vmem:[%s2752_s9] sm:$0xff]   ;;  %v2553_v10 = vld [vmem:[%s2752_s9 + $0x8] sm:$0xff]   ;;  %v2555_v12 = vld [vmem:[%s2752_s9 + $0x10] sm:$0xff]   ;;  %s2589_s30 = scalar_lea.vmem %s2588_s29, 8192 }
  0x18   : > { %v2552_v5 = vld [vmem:[%s2752_s9 + $0x80] sm:$0xff]   ;;  %2406 = vmatprep.mubr.bf16.mxu0 %v2551_v4  ;;  %v2554_v11 = vld [vmem:[%s2752_s9 + $0x88] sm:$0xff]   ;;  %v2556_v13 = vld [vmem:[%s2752_s9 + $0x90] sm:$0xff]  }
  0x19   : > { %2438 = vmatprep.mubr.bf16.mxu1 %v2552_v5  ;;  %v2557_v14 = vld [vmem:[%s2752_s9 + $0x18] sm:$0xff]   ;;  %v2559_v16 = vld [vmem:[%s2752_s9 + $0x20] sm:$0xff]   ;;  %v2561_v18 = vld [vmem:[%s2752_s9 + $0x28] sm:$0xff]  }
  0x1a   : > { %2393 = vmatpush3.bf16.msra.mxu0 %v2544_v1  ;;  %2479 = vmatpush3.bf16.msra.mxu1 %v2544_v1  ;;  %v2558_v15 = vld [vmem:[%s2752_s9 + $0x98] sm:$0xff]   ;;  %v2560_v17 = vld [vmem:[%s2752_s9 + $0xa0] sm:$0xff]   ;;  %v2562_v19 = vld [vmem:[%s2752_s9 + $0xa8] sm:$0xff]  }
  0x1b   : > { %2394 = vmatprep.subr.bf16.mxu0 %v2545_v2  ;;  %2472 = vmatprep.subr.bf16.mxu1 %v2545_v2  ;;  %v2563_v20 = vld [vmem:[%s2752_s9 + $0x30] sm:$0xff]   ;;  %v2565_v22 = vld [vmem:[%s2752_s9 + $0x38] sm:$0xff]   ;;  %v2567_v24 = vld [vmem:[%s2752_s9 + $0x40] sm:$0xff]  }
  0x1c   : > { %v2564_v21 = vld [vmem:[%s2752_s9 + $0xb0] sm:$0xff]   ;;  %v2566_v23 = vld [vmem:[%s2752_s9 + $0xb8] sm:$0xff]   ;;  %v2568_v25 = vld [vmem:[%s2752_s9 + $0xc0] sm:$0xff]  }
  0x1d   : > { %v2569_v26 = vld [vmem:[%s2752_s9 + $0x48] sm:$0xff]   ;;  %v2571_v28 = vld [vmem:[%s2752_s9 + $0x50] sm:$0xff]   ;;  %v2573_v30 = vld [vmem:[%s2752_s9 + $0x58] sm:$0xff]  }
  0x1e   : > { %2395 = vmatpush3.bf16.msra.mxu0 %v2545_v2  ;;  %2480 = vmatpush3.bf16.msra.mxu1 %v2545_v2  ;;  %v2570_v27 = vld [vmem:[%s2752_s9 + $0xc8] sm:$0xff]   ;;  %v2572_v29 = vld [vmem:[%s2752_s9 + $0xd0] sm:$0xff]   ;;  %v2574_v31 = vld [vmem:[%s2752_s9 + $0xd8] sm:$0xff]  }
  0x1f   : > { %2396 = vmatprep.subr.bf16.mxu0 %v2546_v3  ;;  %2473 = vmatprep.subr.bf16.mxu1 %v2546_v3  ;;  %v2575_v32 = vld [vmem:[%s2752_s9 + $0x60] sm:$0xff]   ;;  %v2577_v34 = vld [vmem:[%s2752_s9 + $0x68] sm:$0xff]   ;;  %v2579_v36 = vld [vmem:[%s2752_s9 + $0x70] sm:$0xff]  }
  0x20   : > { %v2576_v33 = vld [vmem:[%s2752_s9 + $0xe0] sm:$0xff]   ;;  %v2578_v35 = vld [vmem:[%s2752_s9 + $0xe8] sm:$0xff]   ;;  %v2580_v37 = vld [vmem:[%s2752_s9 + $0xf0] sm:$0xff]  }
  0x21   : > { %v2581_v38 = vld [vmem:[%s2752_s9 + $0x78] sm:$0xff]   ;;  %v2804_v40 = vld [vmem:[%s3148_s2] ss:$0 sm:$0xff]  ;;  %v2809_v42 = vld [vmem:[%s3148_s2 + $0x1] ss:$0 sm:$0xff] }
  0x22   : > { %2397 = vmatpush3.bf16.msra.mxu0 %v2546_v3  ;;  %2481 = vmatpush3.bf16.msra.mxu1 %v2546_v3  ;;  %v2582_v39 = vld [vmem:[%s2752_s9 + $0xf8] sm:$0xff]   ;;  %v2816_v46 = vld [vmem:[%s3148_s2 + $0x2] ss:$0 sm:$0xff]  ;;  %s228_s9 = sand.u32 1, %s2643_s13  }
  0x23   : > { %2398 = vmatprep.subr.bf16.mxu0 %v2547_v6  ;;  %2474 = vmatprep.subr.bf16.mxu1 %v2547_v6  ;;  %s1979_s10 = sshll.u32 %s228_s9, 8  ;;  %s3101_s15 = scalar_lea.sflag [#allocation4], %s228_s9 }
  0x24   : > { %s2848_s11 = scalar_lea.vmem [#allocation3], %s1979_s10 }
  0x25   : > { %s1861_s19 = sshll.u32 %s2848_s11, 4  ;;  %s3096_s19 = int_to_ptr.vmem [resolvable:$true] %s1861_s19 }
  0x26   : > { %2399 = vmatpush3.bf16.msra.mxu0 %v2547_v6  ;;  %2482 = vmatpush3.bf16.msra.mxu1 %v2547_v6  ;;  %s2583_s27 = scalar_lea.vmem %s3096_s19, 4096  ;;  %p2590_p1 = scmp.lt.s32.totalorder %s3096_s19, %s2588_s29 }
  0x27   : > { %2400 = vmatprep.subr.bf16.mxu0 %v2548_v7  ;;  %2475 = vmatprep.subr.bf16.mxu1 %v2548_v7  ;;  %p2584_p12 = scmp.ne.s32.totalorder %s3096_s19, %s2583_s27  ;;  %p2591_p2 = scmp.lt.s32.totalorder %s2589_s30, %s2583_s27 }
  0x29   : > { %p2585_p13 = pnand %p2584_p12, %p2724_p4  ;;  %p2592_p3 = por %p2591_p2, %p2590_p1 }
  0x2a   : > { %2401 = vmatpush3.bf16.msra.mxu0 %v2548_v7  ;;  %2483 = vmatpush3.bf16.msra.mxu1 %v2548_v7 }
  0x2b   : > { %2402 = vmatprep.subr.bf16.mxu0 %v2549_v8  ;;  %2476 = vmatprep.subr.bf16.mxu1 %v2549_v8  ;;  %p2586_p0 = pneg %p2585_p13 }
  0x2d   : > { %p2593_p5 = pnand %p2592_p3, %p2586_p0 }
  0x2e   : > { %2403 = vmatpush3.bf16.msra.mxu0 %v2549_v8  ;;  %2484 = vmatpush3.bf16.msra.mxu1 %v2549_v8 }
  0x2f   : > { %2404 = vmatprep.subr.bf16.mxu0 %v2550_v9  ;;  %2477 = vmatprep.subr.bf16.mxu1 %v2550_v9 }
  0x32   : > { %2405 = vmatpush3.bf16.msra.mxu0 %v2550_v9  ;;  %2485 = vmatpush3.bf16.msra.mxu1 %v2550_v9 }
  0x35   : > { %2407 = vmatmul.mubr.bf16.vlgmr.msra.gmra.mxu0 %v2553_v10  ;;  %2439 = vmatmul.mubr.bf16.vlgmr.msra.gmra.mxu1 %v2554_v11 }
  0x36   : > { %2410 = vmatprep.mubr.bf16.mxu0 %v2555_v12  ;;  %2442 = vmatprep.mubr.bf16.mxu1 %v2556_v13 }
  0x3d   : > { %2411 = vmatmul.mubr.bf16.gmra.mxu0 %v2557_v14  ;;  %2443 = vmatmul.mubr.bf16.gmra.mxu1 %v2558_v15 }
  0x3e   : > { %2414 = vmatprep.mubr.bf16.mxu0 %v2559_v16  ;;  %2446 = vmatprep.mubr.bf16.mxu1 %v2560_v17 }
  0x45   : > { %2415 = vmatmul.mubr.bf16.gmra.mxu0 %v2561_v18  ;;  %2447 = vmatmul.mubr.bf16.gmra.mxu1 %v2562_v19 }
  0x46   : > { %2418 = vmatprep.mubr.bf16.mxu0 %v2563_v20  ;;  %2450 = vmatprep.mubr.bf16.mxu1 %v2564_v21 }
  0x4d   : > { %2419 = vmatmul.mubr.bf16.gmra.mxu0 %v2565_v22  ;;  %2451 = vmatmul.mubr.bf16.gmra.mxu1 %v2566_v23 }
  0x4e   : > { %2422 = vmatprep.mubr.bf16.mxu0 %v2567_v24  ;;  %2454 = vmatprep.mubr.bf16.mxu1 %v2568_v25 }
  0x55   : > { %2423 = vmatmul.mubr.bf16.gmra.mxu0 %v2569_v26  ;;  %2455 = vmatmul.mubr.bf16.gmra.mxu1 %v2570_v27 }
  0x56   : > { %2426 = vmatprep.mubr.bf16.mxu0 %v2571_v28  ;;  %2458 = vmatprep.mubr.bf16.mxu1 %v2572_v29 }
  0x5d   : > { %2427 = vmatmul.mubr.bf16.gmra.mxu0 %v2573_v30  ;;  %2459 = vmatmul.mubr.bf16.gmra.mxu1 %v2574_v31 }
  0x5e   : > { %2430 = vmatprep.mubr.bf16.mxu0 %v2575_v32  ;;  %2462 = vmatprep.mubr.bf16.mxu1 %v2576_v33 }
  0x65   : > { %2431 = vmatmul.mubr.bf16.gmra.mxu0 %v2577_v34  ;;  %2463 = vmatmul.mubr.bf16.gmra.mxu1 %v2578_v35 }
  0x66   : > { %2434 = vmatprep.mubr.bf16.mxu0 %v2579_v36  ;;  %2466 = vmatprep.mubr.bf16.mxu1 %v2580_v37 }
  0x6d   : > { %2435 = vmatmul.mubr.bf16.gmra.mxu0 %v2581_v38  ;;  %2467 = vmatmul.mubr.bf16.gmra.mxu1 %v2582_v39 }
  0xf5   : > { %v2408_v41 = vpop.f32.mrf.mxu0  ;;  %v2440_v43 = vpop.f32.mrf.mxu1 }
  0xf6   : > { %v1200_v44 = vmul.f32 %v2408_v41, %v2804_v40  ;;  %v1232_v45 = vmul.f32 %v2440_v43, %v2804_v40 }
  0xf7   : > { %v741_v47 = vpop.f32.mrf.mxu0  ;;  %v869_v48 = vpop.f32.mrf.mxu1 }
  0xf8   : > { %v1268_v49 = vadd.f32 %v2809_v42, %v1200_v44  ;;  %v1300_v50 = vadd.f32 %v2809_v42, %v1232_v45  ;;  %v1198_v51 = vmul.f32 %v2804_v40, %v741_v47  ;;  %v1230_v52 = vmul.f32 %v2804_v40, %v869_v48 }
  0xf9   : > { %v2409_v53 = vpop.f32.mrf.mxu0  ;;  %v2441_v54 = vpop.f32.mrf.mxu1 }
  0xfa   : > { %vm1332_vm0 = vcmp.ge.f32.partialorder %v1268_v49, 0.0  ;;  %v1400_v55 = vmul.f32 %v2816_v46, %v1268_v49  ;;  %vm1364_vm1 = vcmp.ge.f32.partialorder %v1300_v50, 0.0  ;;  %v1432_v56 = vmul.f32 %v2816_v46, %v1300_v50 }
  0xfb   : > { %v1266_v57 = vadd.f32 %v2809_v42, %v1198_v51  ;;  %v1298_v58 = vadd.f32 %v2809_v42, %v1230_v52  ;;  %v1201_v59 = vmul.f32 %v2409_v53, %v2804_v40  ;;  %v1233_v60 = vmul.f32 %v2441_v54, %v2804_v40  ;;  %v744_v61 = vpop.f32.mrf.mxu0  ;;  %v872_v62 = vpop.f32.mrf.mxu1 }
  0xfc   : > { %v1464_v63 = vsel %vm1332_vm0, %v1268_v49, %v1400_v55  ;;  %v1496_v0 = vsel %vm1364_vm1, %v1300_v50, %v1432_v56  ;;  %v1199_v1 = vmul.f32 %v2804_v40, %v744_v61  ;;  %v1231_v2 = vmul.f32 %v2804_v40, %v872_v62 }
  0xfd   : > { %vm1330_vm2 = vcmp.ge.f32.partialorder %v1266_v57, 0.0  ;;  %v1398_v3 = vmul.f32 %v2816_v46, %v1266_v57  ;;  %vm1362_vm3 = vcmp.ge.f32.partialorder %v1298_v58, 0.0  ;;  %v1430_v4 = vmul.f32 %v2816_v46, %v1298_v58  ;;  %v2412_v5 = vpop.f32.mrf.mxu0  ;;  %v2444_v6 = vpop.f32.mrf.mxu1 }
  0xfe   : > { %v1269_v7 = vadd.f32 %v2809_v42, %v1201_v59  ;;  %v1301_v8 = vadd.f32 %v2809_v42, %v1233_v60  ;;  %v1267_v9 = vadd.f32 %v2809_v42, %v1199_v1  ;;  %v1299_v10 = vadd.f32 %v2809_v42, %v1231_v2 }
  0xff   : > { %v1462_v11 = vsel %vm1330_vm2, %v1266_v57, %v1398_v3  ;;  %v1494_v12 = vsel %vm1362_vm3, %v1298_v58, %v1430_v4  ;;  %v1204_v13 = vmul.f32 %v2412_v5, %v2804_v40  ;;  %v1236_v14 = vmul.f32 %v2444_v6, %v2804_v40  ;;  %v757_v15 = vpop.f32.mrf.mxu0  ;;  %v885_v16 = vpop.f32.mrf.mxu1 }
 0x100   : > { %vm1333_vm4 = vcmp.ge.f32.partialorder %v1269_v7, 0.0  ;;  %v1401_v17 = vmul.f32 %v2816_v46, %v1269_v7  ;;  %vm1365_vm5 = vcmp.ge.f32.partialorder %v1301_v8, 0.0  ;;  %v1433_v18 = vmul.f32 %v2816_v46, %v1301_v8 }
 0x101   : > { %vm1331_vm6 = vcmp.ge.f32.partialorder %v1267_v9, 0.0  ;;  %v1399_v19 = vmul.f32 %v2816_v46, %v1267_v9  ;;  %vm1363_vm7 = vcmp.ge.f32.partialorder %v1299_v10, 0.0  ;;  %v1431_v20 = vmul.f32 %v2816_v46, %v1299_v10  ;;  %v2413_v21 = vpop.f32.mrf.mxu0  ;;  %v2445_v22 = vpop.f32.mrf.mxu1 }
 0x102   : > { %v1465_v23 = vsel %vm1333_vm4, %v1269_v7, %v1401_v17  ;;  %v1497_v24 = vsel %vm1365_vm5, %v1301_v8, %v1433_v18  ;;  %v1272_v25 = vadd.f32 %v2809_v42, %v1204_v13  ;;  %v1304_v26 = vadd.f32 %v2809_v42, %v1236_v14 }
 0x103   : > { %v2167_v27 = vpack.c.bf16 %v1465_v23, %v1464_v63  ;;  %v2247_v28 = vpack.c.bf16 %v1497_v24, %v1496_v0  ;;  %v1463_v29 = vsel %vm1331_vm6, %v1267_v9, %v1399_v19  ;;  %v1495_v30 = vsel %vm1363_vm7, %v1299_v10, %v1431_v20  ;;  %v760_v31 = vpop.f32.mrf.mxu0  ;;  %v888_v32 = vpop.f32.mrf.mxu1 }
 0x104   : > { %v2162_v33 = vpack.c.bf16 %v1463_v29, %v1462_v11  ;;  %v2242_v34 = vpack.c.bf16 %v1495_v30, %v1494_v12  ;;  %vm1336_vm8 = vcmp.ge.f32.partialorder %v1272_v25, 0.0  ;;  %v1404_v35 = vmul.f32 %v2816_v46, %v1272_v25 }
 0x105   : > { %2319 = vst [vmem:[%s2848_s11 + $0x8] sm:$0xff] %v2167_v27   ;;  %2335 = vst [vmem:[%s2848_s11 + $0x88] sm:$0xff] %v2247_v28   ;;  %vm1368_vm9 = vcmp.ge.f32.partialorder %v1304_v26, 0.0  ;;  %v1436_v36 = vmul.f32 %v2816_v46, %v1304_v26  ;;  %v1202_v37 = vmul.f32 %v2804_v40, %v757_v15  ;;  %v1234_v38 = vmul.f32 %v2804_v40, %v885_v16  ;;  %v2416_v39 = vpop.f32.mrf.mxu0  ;;  %v2448_v41 = vpop.f32.mrf.mxu1 }
 0x106   : > { %2163 = vst [vmem:[%s2848_s11] sm:$0xff] %v2162_v33   ;;  %2334 = vst [vmem:[%s2848_s11 + $0x80] sm:$0xff] %v2242_v34   ;;  %v1468_v43 = vsel %vm1336_vm8, %v1272_v25, %v1404_v35  ;;  %v1205_v44 = vmul.f32 %v2413_v21, %v2804_v40  ;;  %v1237_v45 = vmul.f32 %v2445_v22, %v2804_v40 }
 0x107   : > { %v1203_v47 = vmul.f32 %v2804_v40, %v760_v31  ;;  %v1500_v48 = vsel %vm1368_vm9, %v1304_v26, %v1436_v36  ;;  %v1270_v49 = vadd.f32 %v2809_v42, %v1202_v37  ;;  %v1302_v50 = vadd.f32 %v2809_v42, %v1234_v38  ;;  %v773_v52 = vpop.f32.mrf.mxu0  ;;  %v901_v53 = vpop.f32.mrf.mxu1 }
 0x108   : > { %v1235_v51 = vmul.f32 %v2804_v40, %v888_v32  ;;  %v1273_v54 = vadd.f32 %v2809_v42, %v1205_v44  ;;  %v1305_v55 = vadd.f32 %v2809_v42, %v1237_v45  ;;  %v1208_v57 = vmul.f32 %v2416_v39, %v2804_v40 }
 0x109   : > { %v1271_v56 = vadd.f32 %v2809_v42, %v1203_v47  ;;  %vm1334_vm10 = vcmp.ge.f32.partialorder %v1270_v49, 0.0  ;;  %v1402_v58 = vmul.f32 %v2816_v46, %v1270_v49  ;;  %vm1366_vm11 = vcmp.ge.f32.partialorder %v1302_v50, 0.0  ;;  %v2417_v60 = vpop.f32.mrf.mxu0  ;;  %v2449_v61 = vpop.f32.mrf.mxu1 }
 0x10a   : > { %v1434_v59 = vmul.f32 %v2816_v46, %v1302_v50  ;;  %vm1337_vm12 = vcmp.ge.f32.partialorder %v1273_v54, 0.0  ;;  %v1405_v62 = vmul.f32 %v2816_v46, %v1273_v54  ;;  %vm1369_vm13 = vcmp.ge.f32.partialorder %v1305_v55, 0.0 }
 0x10b   : > { %v1437_v63 = vmul.f32 %v2816_v46, %v1305_v55  ;;  %v1466_v0 = vsel %vm1334_vm10, %v1270_v49, %v1402_v58  ;;  %vm1335_vm14 = vcmp.ge.f32.partialorder %v1271_v56, 0.0  ;;  %v1403_v2 = vmul.f32 %v2816_v46, %v1271_v56  ;;  %v776_v3 = vpop.f32.mrf.mxu0  ;;  %v904_v4 = vpop.f32.mrf.mxu1 }
 0x10c   : > { %v1498_v1 = vsel %vm1366_vm11, %v1302_v50, %v1434_v59  ;;  %v1469_v5 = vsel %vm1337_vm12, %v1273_v54, %v1405_v62  ;;  %v1303_v7 = vadd.f32 %v2809_v42, %v1235_v51  ;;  %v1276_v8 = vadd.f32 %v2809_v42, %v1208_v57 }
 0x10d   : > { %v1501_v6 = vsel %vm1369_vm13, %v1305_v55, %v1437_v63  ;;  %v2177_v9 = vpack.c.bf16 %v1469_v5, %v1468_v43  ;;  %v1467_v11 = vsel %vm1335_vm14, %v1271_v56, %v1403_v2  ;;  %v1240_v12 = vmul.f32 %v2448_v41, %v2804_v40  ;;  %v2420_v13 = vpop.f32.mrf.mxu0  ;;  %v2452_v14 = vpop.f32.mrf.mxu1 }
 0x10e   : > { %v2257_v10 = vpack.c.bf16 %v1501_v6, %v1500_v48  ;;  %v2172_v15 = vpack.c.bf16 %v1467_v11, %v1466_v0  ;;  %vm1367_vm15 = vcmp.ge.f32.partialorder %v1303_v7, 0.0  ;;  %v1435_v16 = vmul.f32 %v2816_v46, %v1303_v7 }
 0x10f   : > { %vm1340_vm0 = vcmp.ge.f32.partialorder %v1276_v8, 0.0  ;;  %2321 = vst [vmem:[%s2848_s11 + $0x18] sm:$0xff] %v2177_v9   ;;  %v1408_v17 = vmul.f32 %v2816_v46, %v1276_v8  ;;  %v1308_v18 = vadd.f32 %v2809_v42, %v1240_v12  ;;  %v1206_v19 = vmul.f32 %v2804_v40, %v773_v52  ;;  %v789_v21 = vpop.f32.mrf.mxu0  ;;  %v917_v22 = vpop.f32.mrf.mxu1 }
 0x110   : > { %2337 = vst [vmem:[%s2848_s11 + $0x98] sm:$0xff] %v2257_v10   ;;  %v1238_v20 = vmul.f32 %v2804_v40, %v901_v53  ;;  %2320 = vst [vmem:[%s2848_s11 + $0x10] sm:$0xff] %v2172_v15   ;;  %v1499_v23 = vsel %vm1367_vm15, %v1303_v7, %v1435_v16  ;;  %v1209_v24 = vmul.f32 %v2417_v60, %v2804_v40 }
 0x111   : > { %v1241_v25 = vmul.f32 %v2449_v61, %v2804_v40  ;;  %v1207_v26 = vmul.f32 %v2804_v40, %v776_v3  ;;  %v2252_v27 = vpack.c.bf16 %v1499_v23, %v1498_v1  ;;  %v1472_v28 = vsel %vm1340_vm0, %v1276_v8, %v1408_v17  ;;  %v2421_v30 = vpop.f32.mrf.mxu0  ;;  %v2453_v31 = vpop.f32.mrf.mxu1 }
 0x112   : > { %vm1372_vm1 = vcmp.ge.f32.partialorder %v1308_v18, 0.0  ;;  %v1440_v29 = vmul.f32 %v2816_v46, %v1308_v18  ;;  %v1274_v32 = vadd.f32 %v2809_v42, %v1206_v19  ;;  %v1306_v33 = vadd.f32 %v2809_v42, %v1238_v20 }
 0x113   : > { %v1277_v34 = vadd.f32 %v2809_v42, %v1209_v24  ;;  %v1309_v35 = vadd.f32 %v2809_v42, %v1241_v25  ;;  %2336 = vst [vmem:[%s2848_s11 + $0x90] sm:$0xff] %v2252_v27   ;;  %v1275_v37 = vadd.f32 %v2809_v42, %v1207_v26  ;;  %v1239_v38 = vmul.f32 %v2804_v40, %v904_v4  ;;  %v792_v41 = vpop.f32.mrf.mxu0  ;;  %v920_v43 = vpop.f32.mrf.mxu1 }
 0x114   : > { %v1504_v36 = vsel %vm1372_vm1, %v1308_v18, %v1440_v29  ;;  %v1212_v39 = vmul.f32 %v2420_v13, %v2804_v40  ;;  %vm1338_vm2 = vcmp.ge.f32.partialorder %v1274_v32, 0.0  ;;  %v1406_v44 = vmul.f32 %v2816_v46, %v1274_v32 }
 0x115   : > { %vm1370_vm3 = vcmp.ge.f32.partialorder %v1306_v33, 0.0  ;;  %v1438_v45 = vmul.f32 %v2816_v46, %v1306_v33  ;;  %vm1341_vm4 = vcmp.ge.f32.partialorder %v1277_v34, 0.0  ;;  %v1409_v47 = vmul.f32 %v2816_v46, %v1277_v34  ;;  %v2424_v49 = vpop.f32.mrf.mxu0  ;;  %v2899_v50 = vpop.f32.mrf.mxu1 }
 0x116   : > { %vm1373_vm5 = vcmp.ge.f32.partialorder %v1309_v35, 0.0  ;;  %v1441_v48 = vmul.f32 %v2816_v46, %v1309_v35  ;;  %v1470_v51 = vsel %vm1338_vm2, %v1274_v32, %v1406_v44  ;;  %vm1339_vm6 = vcmp.ge.f32.partialorder %v1275_v37, 0.0 }
 0x117   : > { %v1502_v52 = vsel %vm1370_vm3, %v1306_v33, %v1438_v45  ;;  %v1407_v53 = vmul.f32 %v2816_v46, %v1275_v37  ;;  %v1473_v54 = vsel %vm1341_vm4, %v1277_v34, %v1409_v47  ;;  %v1307_v56 = vadd.f32 %v2809_v42, %v1239_v38  ;;  %v2904_v58 = vpop.f32.mrf.mxu0  ;;  %v2906_v59 = vpop.f32.mrf.mxu1 }
 0x118   : > { %v1505_v55 = vsel %vm1373_vm5, %v1309_v35, %v1441_v48  ;;  %v1280_v57 = vadd.f32 %v2809_v42, %v1212_v39  ;;  %v2187_v60 = vpack.c.bf16 %v1473_v54, %v1472_v28  ;;  %v1244_v63 = vmul.f32 %v2452_v14, %v2804_v40 }
 0x119   : > { %v2267_v61 = vpack.c.bf16 %v1505_v55, %v1504_v36  ;;  %v1471_v62 = vsel %vm1339_vm6, %v1275_v37, %v1407_v53  ;;  %vm1371_vm7 = vcmp.ge.f32.partialorder %v1307_v56, 0.0  ;;  %v1439_v1 = vmul.f32 %v2816_v46, %v1307_v56  ;;  %v2910_v2 = vpop.f32.mrf.mxu0  ;;  %v2912_v3 = vpop.f32.mrf.mxu1 }
 0x11a   : > { %v2182_v0 = vpack.c.bf16 %v1471_v62, %v1470_v51  ;;  %vm1344_vm8 = vcmp.ge.f32.partialorder %v1280_v57, 0.0  ;;  %2323 = vst [vmem:[%s2848_s11 + $0x28] sm:$0xff] %v2187_v60   ;;  %v1412_v4 = vmul.f32 %v2816_v46, %v1280_v57  ;;  %v1312_v5 = vadd.f32 %v2809_v42, %v1244_v63 }
 0x11b   : > { %2339 = vst [vmem:[%s2848_s11 + $0xa8] sm:$0xff] %v2267_v61   ;;  %v1210_v6 = vmul.f32 %v2804_v40, %v789_v21  ;;  %v1242_v7 = vmul.f32 %v2804_v40, %v917_v22  ;;  %v1503_v8 = vsel %vm1371_vm7, %v1307_v56, %v1439_v1  ;;  %v1213_v9 = vmul.f32 %v2421_v30, %v2804_v40  ;;  %v808_v12 = vpop.f32.mrf.mxu0  ;;  %v2924_v13 = vpop.f32.mrf.mxu1 }
 0x11c   : > { %2322 = vst [vmem:[%s2848_s11 + $0x20] sm:$0xff] %v2182_v0   ;;  %v1245_v10 = vmul.f32 %v2453_v31, %v2804_v40  ;;  %v1211_v11 = vmul.f32 %v2804_v40, %v792_v41  ;;  %v2262_v14 = vpack.c.bf16 %v1503_v8, %v1502_v52  ;;  %v1476_v15 = vsel %vm1344_vm8, %v1280_v57, %v1412_v4 }
 0x11d   : > { %vm1376_vm9 = vcmp.ge.f32.partialorder %v1312_v5, 0.0  ;;  %v1444_v16 = vmul.f32 %v2816_v46, %v1312_v5  ;;  %v1278_v17 = vadd.f32 %v2809_v42, %v1210_v6  ;;  %v1310_v18 = vadd.f32 %v2809_v42, %v1242_v7  ;;  %v2428_v21 = vpop.f32.mrf.mxu0  ;;  %v2932_v22 = vpop.f32.mrf.mxu1 }
 0x11e   : > { %v1281_v19 = vadd.f32 %v2809_v42, %v1213_v9  ;;  %v1313_v20 = vadd.f32 %v2809_v42, %v1245_v10  ;;  %2338 = vst [vmem:[%s2848_s11 + $0xa0] sm:$0xff] %v2262_v14   ;;  %v1279_v24 = vadd.f32 %v2809_v42, %v1211_v11  ;;  %v1243_v25 = vmul.f32 %v2804_v40, %v920_v43 }
 0x11f   : > { %v1508_v23 = vsel %vm1376_vm9, %v1312_v5, %v1444_v16  ;;  %v1216_v26 = vmul.f32 %v2424_v49, %v2804_v40  ;;  %vm1342_vm10 = vcmp.ge.f32.partialorder %v1278_v17, 0.0  ;;  %v1410_v27 = vmul.f32 %v2816_v46, %v1278_v17  ;;  %v2940_v29 = vpop.f32.mrf.mxu0  ;;  %v2942_v30 = vpop.f32.mrf.mxu1 }
 0x120   : > { %vm1374_vm11 = vcmp.ge.f32.partialorder %v1310_v18, 0.0  ;;  %v1442_v28 = vmul.f32 %v2816_v46, %v1310_v18  ;;  %vm1345_vm12 = vcmp.ge.f32.partialorder %v1281_v19, 0.0  ;;  %v1413_v31 = vmul.f32 %v2816_v46, %v1281_v19 }
 0x121   : > { %vm1377_vm13 = vcmp.ge.f32.partialorder %v1313_v20, 0.0  ;;  %v1445_v32 = vmul.f32 %v2816_v46, %v1313_v20  ;;  %v1474_v33 = vsel %vm1342_vm10, %v1278_v17, %v1410_v27  ;;  %vm1343_vm14 = vcmp.ge.f32.partialorder %v1279_v24, 0.0  ;;  %v2947_v36 = vpop.f32.mrf.mxu0  ;;  %v2953_v48 = vpop.f32.mrf.mxu1 }
 0x122   : > { %v1506_v34 = vsel %vm1374_vm11, %v1310_v18, %v1442_v28  ;;  %v1411_v35 = vmul.f32 %v2816_v46, %v1279_v24  ;;  %v1477_v37 = vsel %vm1345_vm12, %v1281_v19, %v1413_v31  ;;  %v1311_v39 = vadd.f32 %v2809_v42, %v1243_v25 }
 0x123   : > { %v1509_v38 = vsel %vm1377_vm13, %v1313_v20, %v1445_v32  ;;  %v1284_v41 = vadd.f32 %v2809_v42, %v1216_v26  ;;  %v2197_v43 = vpack.c.bf16 %v1477_v37, %v1476_v15  ;;  %v1248_v47 = vmul.f32 %v2899_v50, %v2804_v40  ;;  %v2956_v52 = vpop.f32.mrf.mxu0 }
 0x124   : > { %v2277_v44 = vpack.c.bf16 %v1509_v38, %v1508_v23  ;;  %v1475_v45 = vsel %vm1343_vm14, %v1279_v24, %v1411_v35  ;;  %vm1375_vm15 = vcmp.ge.f32.partialorder %v1311_v39, 0.0  ;;  %v1443_v51 = vmul.f32 %v2816_v46, %v1311_v39 }
 0x125   : > { %v2192_v49 = vpack.c.bf16 %v1475_v45, %v1474_v33  ;;  %vm1348_vm0 = vcmp.ge.f32.partialorder %v1284_v41, 0.0  ;;  %2325 = vst [vmem:[%s2848_s11 + $0x38] sm:$0xff] %v2197_v43   ;;  %v1416_v53 = vmul.f32 %v2816_v46, %v1284_v41  ;;  %v1316_v54 = vadd.f32 %v2809_v42, %v1248_v47 }
 0x126   : > { %2341 = vst [vmem:[%s2848_s11 + $0xb8] sm:$0xff] %v2277_v44   ;;  %v1214_v55 = vmul.f32 %v2804_v40, %v2904_v58  ;;  %v1246_v50 = vmul.f32 %v2804_v40, %v2906_v59  ;;  %v1507_v56 = vsel %vm1375_vm15, %v1311_v39, %v1443_v51  ;;  %v1217_v57 = vmul.f32 %v2910_v2, %v2804_v40  ;;  %v952_v58 = vpop.f32.mrf.mxu1  ;;  %v2432_v2 = vpop.f32.mrf.mxu0 }
 0x127   : > { %2324 = vst [vmem:[%s2848_s11 + $0x30] sm:$0xff] %v2192_v49   ;;  %v1249_v60 = vmul.f32 %v2912_v3, %v2804_v40  ;;  %v1215_v61 = vmul.f32 %v2804_v40, %v808_v12  ;;  %v2272_v62 = vpack.c.bf16 %v1507_v56, %v1506_v34  ;;  %v1480_v63 = vsel %vm1348_vm0, %v1284_v41, %v1416_v53 }
 0x128   : > { %vm1380_vm1 = vcmp.ge.f32.partialorder %v1316_v54, 0.0  ;;  %v1448_v0 = vmul.f32 %v2816_v46, %v1316_v54  ;;  %v1282_v1 = vadd.f32 %v2809_v42, %v1214_v55  ;;  %v1314_v59 = vadd.f32 %v2809_v42, %v1246_v50  ;;  %v2986_v14 = vpop.f32.mrf.mxu1  ;;  %v2989_v17 = vpop.f32.mrf.mxu0 }
 0x129   : > { %v1285_v4 = vadd.f32 %v2809_v42, %v1217_v57  ;;  %v1317_v5 = vadd.f32 %v2809_v42, %v1249_v60  ;;  %2340 = vst [vmem:[%s2848_s11 + $0xb0] sm:$0xff] %v2272_v62   ;;  %v1283_v3 = vadd.f32 %v2809_v42, %v1215_v61  ;;  %v1247_v7 = vmul.f32 %v2804_v40, %v2924_v13 }
 0x12a   : > { %v1512_v6 = vsel %vm1380_vm1, %v1316_v54, %v1448_v0  ;;  %v1220_v8 = vmul.f32 %v2428_v21, %v2804_v40  ;;  %vm1346_vm2 = vcmp.ge.f32.partialorder %v1282_v1, 0.0  ;;  %v1414_v9 = vmul.f32 %v2816_v46, %v1282_v1  ;;  %v965_v31 = vpop.f32.mrf.mxu1 }
 0x12b   : > { %vm1378_vm3 = vcmp.ge.f32.partialorder %v1314_v59, 0.0  ;;  %v1446_v10 = vmul.f32 %v2816_v46, %v1314_v59  ;;  %vm1349_vm4 = vcmp.ge.f32.partialorder %v1285_v4, 0.0  ;;  %v1417_v11 = vmul.f32 %v2816_v46, %v1285_v4 }
 0x12c   : > { %vm1381_vm5 = vcmp.ge.f32.partialorder %v1317_v5, 0.0  ;;  %v1449_v12 = vmul.f32 %v2816_v46, %v1317_v5  ;;  %v1478_v15 = vsel %vm1346_vm2, %v1282_v1, %v1414_v9  ;;  %vm1347_vm6 = vcmp.ge.f32.partialorder %v1283_v3, 0.0 }
 0x12d   : > { %v1510_v16 = vsel %vm1378_vm3, %v1314_v59, %v1446_v10  ;;  %v1415_v13 = vmul.f32 %v2816_v46, %v1283_v3  ;;  %v1481_v18 = vsel %vm1349_vm4, %v1285_v4, %v1417_v11  ;;  %v1315_v20 = vadd.f32 %v2809_v42, %v1247_v7 }
 0x12e   : > { %v1513_v19 = vsel %vm1381_vm5, %v1317_v5, %v1449_v12  ;;  %v1288_v21 = vadd.f32 %v2809_v42, %v1220_v8  ;;  %v2207_v23 = vpack.c.bf16 %v1481_v18, %v1480_v63  ;;  %v1252_v26 = vmul.f32 %v2932_v22, %v2804_v40  ;;  %v2433_v22 = vpop.f32.mrf.mxu0 }
 0x12f   : > { %v2287_v24 = vpack.c.bf16 %v1513_v19, %v1512_v6  ;;  %v1479_v25 = vsel %vm1347_vm6, %v1283_v3, %v1415_v13  ;;  %vm1379_vm7 = vcmp.ge.f32.partialorder %v1315_v20, 0.0  ;;  %v1447_v28 = vmul.f32 %v2816_v46, %v1315_v20 }
 0x130   : > { %v2202_v27 = vpack.c.bf16 %v1479_v25, %v1478_v15  ;;  %vm1352_vm8 = vcmp.ge.f32.partialorder %v1288_v21, 0.0  ;;  %2327 = vst [vmem:[%s2848_s11 + $0x48] sm:$0xff] %v2207_v23   ;;  %v1420_v32 = vmul.f32 %v2816_v46, %v1288_v21  ;;  %v1320_v33 = vadd.f32 %v2809_v42, %v1252_v26  ;;  %v840_v54 = vpop.f32.mrf.mxu0 }
 0x131   : > { %2343 = vst [vmem:[%s2848_s11 + $0xc8] sm:$0xff] %v2287_v24   ;;  %v1218_v34 = vmul.f32 %v2804_v40, %v2940_v29  ;;  %v1250_v35 = vmul.f32 %v2804_v40, %v2942_v30  ;;  %v1511_v37 = vsel %vm1379_vm7, %v1315_v20, %v1447_v28  ;;  %v1221_v38 = vmul.f32 %v2947_v36, %v2804_v40  ;;  %v2465_v36 = vpop.f32.mrf.mxu1 }
 0x132   : > { %2326 = vst [vmem:[%s2848_s11 + $0x40] sm:$0xff] %v2202_v27   ;;  %v1253_v39 = vmul.f32 %v2953_v48, %v2804_v40  ;;  %v1219_v41 = vmul.f32 %v2804_v40, %v2956_v52  ;;  %v2282_v43 = vpack.c.bf16 %v1511_v37, %v1510_v16  ;;  %v1484_v44 = vsel %vm1352_vm8, %v1288_v21, %v1420_v32  ;;  %v2436_v4 = vpop.f32.mrf.mxu0 }
 0x133   : > { %vm1384_vm9 = vcmp.ge.f32.partialorder %v1320_v33, 0.0  ;;  %v1452_v29 = vmul.f32 %v2816_v46, %v1320_v33  ;;  %v1286_v30 = vadd.f32 %v2809_v42, %v1218_v34  ;;  %v1318_v45 = vadd.f32 %v2809_v42, %v1250_v35  ;;  %v968_v63 = vpop.f32.mrf.mxu1 }
 0x134   : > { %v1289_v47 = vadd.f32 %v2809_v42, %v1221_v38  ;;  %v1321_v49 = vadd.f32 %v2809_v42, %v1253_v39  ;;  %2342 = vst [vmem:[%s2848_s11 + $0xc0] sm:$0xff] %v2282_v43   ;;  %v1287_v48 = vadd.f32 %v2809_v42, %v1219_v41  ;;  %v1251_v52 = vmul.f32 %v2804_v40, %v952_v58  ;;  %v853_v19 = vpop.f32.mrf.mxu0 }
 0x135   : > { %v1516_v51 = vsel %vm1384_vm9, %v1320_v33, %v1452_v29  ;;  %v1224_v53 = vmul.f32 %v2432_v2, %v2804_v40  ;;  %vm1350_vm10 = vcmp.ge.f32.partialorder %v1286_v30, 0.0  ;;  %v1418_v55 = vmul.f32 %v2816_v46, %v1286_v30  ;;  %v2468_v15 = vpop.f32.mrf.mxu1 }
 0x136   : > { %vm1382_vm11 = vcmp.ge.f32.partialorder %v1318_v45, 0.0  ;;  %v1450_v50 = vmul.f32 %v2816_v46, %v1318_v45  ;;  %vm1353_vm12 = vcmp.ge.f32.partialorder %v1289_v47, 0.0  ;;  %v1421_v56 = vmul.f32 %v2816_v46, %v1289_v47 }
 0x137   : > { %vm1385_vm13 = vcmp.ge.f32.partialorder %v1321_v49, 0.0  ;;  %v1453_v57 = vmul.f32 %v2816_v46, %v1321_v49  ;;  %v1482_v60 = vsel %vm1350_vm10, %v1286_v30, %v1418_v55  ;;  %vm1351_vm14 = vcmp.ge.f32.partialorder %v1287_v48, 0.0  ;;  %v981_v32 = vpop.f32.mrf.mxu1 }
 0x138   : > { %v1514_v61 = vsel %vm1382_vm11, %v1318_v45, %v1450_v50  ;;  %v1419_v62 = vmul.f32 %v2816_v46, %v1287_v48  ;;  %v1485_v0 = vsel %vm1353_vm12, %v1289_v47, %v1421_v56  ;;  %v1319_v1 = vadd.f32 %v2809_v42, %v1251_v52 }
 0x139   : > { %v1517_v58 = vsel %vm1385_vm13, %v1321_v49, %v1453_v57  ;;  %v1292_v59 = vadd.f32 %v2809_v42, %v1224_v53  ;;  %v2217_v5 = vpack.c.bf16 %v1485_v0, %v1484_v44  ;;  %v1256_v3 = vmul.f32 %v2986_v14, %v2804_v40  ;;  %v2469_v45 = vpop.f32.mrf.mxu1 }
 0x13a   : > { %v2297_v2 = vpack.c.bf16 %v1517_v58, %v1516_v51  ;;  %v1483_v6 = vsel %vm1351_vm14, %v1287_v48, %v1419_v62  ;;  %vm1383_vm15 = vcmp.ge.f32.partialorder %v1319_v1, 0.0  ;;  %v1451_v8 = vmul.f32 %v2816_v46, %v1319_v1 }
 0x13b   : > { %v2212_v7 = vpack.c.bf16 %v1483_v6, %v1482_v60  ;;  %vm1356_vm0 = vcmp.ge.f32.partialorder %v1292_v59, 0.0  ;;  %2329 = vst [vmem:[%s2848_s11 + $0x58] sm:$0xff] %v2217_v5   ;;  %v1424_v9 = vmul.f32 %v2816_v46, %v1292_v59  ;;  %v1324_v10 = vadd.f32 %v2809_v42, %v1256_v3  ;;  %v984_v0 = vpop.f32.mrf.mxu1 }
 0x13c   : > { %2345 = vst [vmem:[%s2848_s11 + $0xd8] sm:$0xff] %v2297_v2   ;;  %v1222_v11 = vmul.f32 %v2804_v40, %v2989_v17  ;;  %v1254_v12 = vmul.f32 %v2804_v40, %v965_v31  ;;  %v1515_v14 = vsel %vm1383_vm15, %v1319_v1, %v1451_v8  ;;  %v1225_v16 = vmul.f32 %v2433_v22, %v2804_v40  ;;  %v2437_v22 = vpop.f32.mrf.mxu0 }
 0x13d   : > { %2328 = vst [vmem:[%s2848_s11 + $0x50] sm:$0xff] %v2212_v7   ;;  %v1257_v13 = vmul.f32 %v2465_v36, %v2804_v40  ;;  %v1223_v18 = vmul.f32 %v2804_v40, %v840_v54  ;;  %v2292_v20 = vpack.c.bf16 %v1515_v14, %v1514_v61  ;;  %vm1388_vm1 = vcmp.ge.f32.partialorder %v1324_v10, 0.0 }
 0x13e   : > { %v1456_v21 = vmul.f32 %v2816_v46, %v1324_v10  ;;  %v1290_v23 = vadd.f32 %v2809_v42, %v1222_v11  ;;  %v1322_v17 = vadd.f32 %v2809_v42, %v1254_v12  ;;  %v1293_v24 = vadd.f32 %v2809_v42, %v1225_v16  ;;  %v856_v48 = vpop.f32.mrf.mxu0 }
 0x13f   : > { %v1325_v25 = vadd.f32 %v2809_v42, %v1257_v13  ;;  %2344 = vst [vmem:[%s2848_s11 + $0xd0] sm:$0xff] %v2292_v20   ;;  %v1488_v26 = vsel %vm1356_vm0, %v1292_v59, %v1424_v9  ;;  %v1291_v27 = vadd.f32 %v2809_v42, %v1223_v18  ;;  %v1255_v28 = vmul.f32 %v2804_v40, %v968_v63 }
 0x140   : > { %v1228_v31 = vmul.f32 %v2436_v4, %v2804_v40  ;;  %v1520_v33 = vsel %vm1388_vm1, %v1324_v10, %v1456_v21  ;;  %vm1354_vm2 = vcmp.ge.f32.partialorder %v1290_v23, 0.0  ;;  %v1422_v34 = vmul.f32 %v2816_v46, %v1290_v23 }
 0x141   : > { %v1454_v35 = vmul.f32 %v2816_v46, %v1322_v17  ;;  %vm1357_vm3 = vcmp.ge.f32.partialorder %v1293_v24, 0.0  ;;  %v1425_v37 = vmul.f32 %v2816_v46, %v1293_v24  ;;  %vm1389_vm4 = vcmp.ge.f32.partialorder %v1325_v25, 0.0 }
 0x142   : > { %v1457_v38 = vmul.f32 %v2816_v46, %v1325_v25  ;;  %v1486_v39 = vsel %vm1354_vm2, %v1290_v23, %v1422_v34  ;;  %vm1386_vm5 = vcmp.ge.f32.partialorder %v1322_v17, 0.0  ;;  %vm1355_vm6 = vcmp.ge.f32.partialorder %v1291_v27, 0.0 }
 0x143   : > { %v1423_v41 = vmul.f32 %v2816_v46, %v1291_v27  ;;  %v1489_v43 = vsel %vm1357_vm3, %v1293_v24, %v1425_v37  ;;  %v1323_v29 = vadd.f32 %v2809_v42, %v1255_v28  ;;  %v1296_v30 = vadd.f32 %v2809_v42, %v1228_v31 }
 0x144   : > { %v1521_v44 = vsel %vm1389_vm4, %v1325_v25, %v1457_v38  ;;  %v2227_v47 = vpack.c.bf16 %v1489_v43, %v1488_v26  ;;  %v1260_v51 = vmul.f32 %v2468_v15, %v2804_v40  ;;  %v1518_v52 = vsel %vm1386_vm5, %v1322_v17, %v1454_v35 }
 0x145   : > { %v2307_v49 = vpack.c.bf16 %v1521_v44, %v1520_v33  ;;  %v1487_v36 = vsel %vm1355_vm6, %v1291_v27, %v1423_v41  ;;  %vm1387_vm7 = vcmp.ge.f32.partialorder %v1323_v29, 0.0  ;;  %v1455_v54 = vmul.f32 %v2816_v46, %v1323_v29 }
 0x146   : > { %v2222_v53 = vpack.c.bf16 %v1487_v36, %v1486_v39  ;;  %2331 = vst [vmem:[%s2848_s11 + $0x68] sm:$0xff] %v2227_v47   ;;  %v1428_v55 = vmul.f32 %v2816_v46, %v1296_v30  ;;  %v1328_v50 = vadd.f32 %v2809_v42, %v1260_v51  ;;  %v1226_v56 = vmul.f32 %v2804_v40, %v853_v19 }
 0x147   : > { %2347 = vst [vmem:[%s2848_s11 + $0xe8] sm:$0xff] %v2307_v49   ;;  %v1258_v57 = vmul.f32 %v2804_v40, %v981_v32  ;;  %v1519_v60 = vsel %vm1387_vm7, %v1323_v29, %v1455_v54  ;;  %v1229_v61 = vmul.f32 %v2437_v22, %v2804_v40  ;;  %v1261_v62 = vmul.f32 %v2469_v45, %v2804_v40 }
 0x148   : > { %2330 = vst [vmem:[%s2848_s11 + $0x60] sm:$0xff] %v2222_v53   ;;  %v1227_v63 = vmul.f32 %v2804_v40, %v856_v48  ;;  %v2302_v58 = vpack.c.bf16 %v1519_v60, %v1518_v52  ;;  %vm1360_vm8 = vcmp.ge.f32.partialorder %v1296_v30, 0.0  ;;  %v1460_v1 = vmul.f32 %v2816_v46, %v1328_v50 }
 0x149   : > { %v1294_v59 = vadd.f32 %v2809_v42, %v1226_v56  ;;  %v1326_v4 = vadd.f32 %v2809_v42, %v1258_v57  ;;  %v1297_v5 = vadd.f32 %v2809_v42, %v1229_v61  ;;  %v1329_v2 = vadd.f32 %v2809_v42, %v1261_v62 }
 0x14a   : > { %2346 = vst [vmem:[%s2848_s11 + $0xe0] sm:$0xff] %v2302_v58   ;;  %vm1392_vm9 = vcmp.ge.f32.partialorder %v1328_v50, 0.0  ;;  %v1295_v6 = vadd.f32 %v2809_v42, %v1227_v63  ;;  %v1259_v3 = vmul.f32 %v2804_v40, %v984_v0  ;;  %v1492_v7 = vsel %vm1360_vm8, %v1296_v30, %v1428_v55 }
 0x14b   : > { %vm1358_vm10 = vcmp.ge.f32.partialorder %v1294_v59, 0.0  ;;  %v1426_v8 = vmul.f32 %v2816_v46, %v1294_v59  ;;  %vm1361_vm11 = vcmp.ge.f32.partialorder %v1297_v5, 0.0  ;;  %v1429_v9 = vmul.f32 %v2816_v46, %v1297_v5 }
 0x14c   : > { %vm1393_vm12 = vcmp.ge.f32.partialorder %v1329_v2, 0.0  ;;  %v1461_v10 = vmul.f32 %v2816_v46, %v1329_v2  ;;  %v1524_v11 = vsel %vm1392_vm9, %v1328_v50, %v1460_v1  ;;  %vm1390_vm13 = vcmp.ge.f32.partialorder %v1326_v4, 0.0 }
 0x14d   : > { %vm1359_vm14 = vcmp.ge.f32.partialorder %v1295_v6, 0.0  ;;  %v1427_v12 = vmul.f32 %v2816_v46, %v1295_v6  ;;  %v1458_v40 = vmul.f32 %v2816_v46, %v1326_v4  ;;  %v1493_v15 = vsel %vm1361_vm11, %v1297_v5, %v1429_v9 }
 0x14e   : > { %v1525_v14 = vsel %vm1393_vm12, %v1329_v2, %v1461_v10  ;;  %v1327_v16 = vadd.f32 %v2809_v42, %v1259_v3  ;;  %v1490_v13 = vsel %vm1358_vm10, %v1294_v59, %v1426_v8  ;;  %v2237_v18 = vpack.c.bf16 %v1493_v15, %v1492_v7 }
 0x14f   : > { %v2317_v19 = vpack.c.bf16 %v1525_v14, %v1524_v11  ;;  %v1491_v20 = vsel %vm1359_vm14, %v1295_v6, %v1427_v12  ;;  %v1522_v17 = vsel %vm1390_vm13, %v1326_v4, %v1458_v40 }
 0x150   : > { %v2232_v21 = vpack.c.bf16 %v1491_v20, %v1490_v13  ;;  %vm1391_vm15 = vcmp.ge.f32.partialorder %v1327_v16, 0.0  ;;  %v1459_v23 = vmul.f32 %v2816_v46, %v1327_v16  ;;  %2333 = vst [vmem:[%s2848_s11 + $0x78] sm:$0xff] %v2237_v18  }
 0x151   : > { %2349 = vst [vmem:[%s2848_s11 + $0xf8] sm:$0xff] %v2317_v19  }
 0x152   : > { %2332 = vst [vmem:[%s2848_s11 + $0x70] sm:$0xff] %v2232_v21   ;;  %v1523_v24 = vsel %vm1391_vm15, %v1327_v16, %v1459_v23 }
 0x153   : > { %v2312_v42 = vpack.c.bf16 %v1523_v24, %v1522_v17 }
 0x155   : > { %2348 = vst [vmem:[%s2848_s11 + $0xf0] sm:$0xff] %v2312_v42  }
 0x156   : > { %2596 = shalt.err (!%p2593_p5)
}
 0x157   : > { %s2597_s4 = scalar_lea.hbm %s3094_s26, 4096  ;;  %s2601_s7 = scalar_lea.hbm %s3149_s3, 16384 }
 0x158   : > { %p2598_p6 = scmp.ne.s32.totalorder %s3094_s26, %s2597_s4  ;;  %p2602_p10 = scmp.lt.s32.totalorder %s3094_s26, %s3149_s3 }
 0x159   : > { %p2603_p11 = scmp.lt.s32.totalorder %s2601_s7, %s2597_s4 }
 0x15a   : > { %p2599_p7 = pnand %p2598_p6, %p2724_p4 }
 0x15b   : > { %p2604_p12 = por %p2603_p11, %p2602_p10 }
 0x15c   : > { %p2600_p9 = pneg %p2599_p7 }
 0x15e   : > { %p2605_p13 = pnand %p2604_p12, %p2600_p9 }
 0x160   : > { %2608 = shalt.err (!%p2605_p13)
}
 0x161   : > { %s2662_s10 = smov 64   ;;  %s2663_s11 = smov 4  }
 0x162   : > { %2486 = dma.vmem_to_hbm [thread:$0]  (%p2724_p4), %s3096_s19, 4096, %s3094_s26, %s3101_s15, %s2662_s10, %s2662_s10, %s2663_s11  }
 0x163 PF: > { %p2492_p0 = scmp.ge.s32.totalorder %s2659_s17, 2  ;;  %s1876_s18 = sand.u32 1, %s2639_s12  }
 0x164   : > { %s1877_s21 = scalar_lea.sflag [#allocation4], %s1876_s18 }
 0x165   : > { %p2489_p1 = pnand %p2492_p0, %p2731_p8 }
 0x167   : > { %p2490_p2 = pneg %p2489_p1 }
 0x169   : > { %2634 = dma.done.wait (%p2490_p2), %s1877_s21, 4096  }
 0x16a   : > { %2636 = vsyncadd (%p2490_p2), %s1877_s21, 4294963200  ;;  %s16_s17 = sadd.s32 1, %s2659_s17   ;;  %s3152_s12 = smov %s2643_s13 }
 0x16b   : > { %p13_p3 = scmp.ge.s32.totalorder %s16_s17, 6   ;;  %s3153_s13 = smov %s2647_s14 }
 0x16c   : > { %s3154_s14 = smov %s2737_s25  ;;  %s3155_s15 = smov %s2655_s16 }
 0x16d   : > { %s3156_s16 = smov %s3158_s20  ;;  %15 = sbr.rel (!%p13_p3) target bundleno = 4 (0x4), region = 81 }
 0x172   :  { %1882 = vsyncpa [#allocation4], 1 }
 0x173   :  { %1884 = vsyncpa [#allocation4 + $0x1], 1 }

</bundles_post_ra>
